<compile_context>
chip_gen: v7x
topology: tpu7x:2x2x1
jax: 0.10.0
libtpu: 0.0.40
codegen_flags: <defaults>
</compile_context>

<pallas_src>
import jax
import jax.numpy as jnp
from jax.experimental import pallas as pl
from jax.experimental.pallas import tpu as pltpu


def firstnet_kernel(x_ref, w0_ref, b0_ref, w1_ref, b1_ref, w2_ref, b2_ref, out_ref):
    # Cast the activation tile to bf16 for the MXU; accumulate in f32.
    x = x_ref[...].astype(jnp.bfloat16)

    # fc0 + relu
    h0 = jnp.dot(x, w0_ref[...], preferred_element_type=jnp.float32) + b0_ref[...]
    h0 = jnp.maximum(h0, 0.0)

    # fc1 + relu
    h1 = jnp.dot(h0.astype(jnp.bfloat16), w1_ref[...],
                 preferred_element_type=jnp.float32) + b1_ref[...]
    h1 = jnp.maximum(h1, 0.0)

    # fc2 + relu (the original module applies ReLU to the logits before log_softmax)
    h2 = jnp.dot(h1.astype(jnp.bfloat16), w2_ref[...],
                 preferred_element_type=jnp.float32) + b2_ref[...]
    h2 = jnp.maximum(h2, 0.0)

    # log_softmax along dim=1 (numerically stable), in f32.
    m = jnp.max(h2, axis=-1, keepdims=True)
    shifted = h2 - m
    lse = jnp.log(jnp.sum(jnp.exp(shifted), axis=-1, keepdims=True))
    out_ref[...] = (shifted - lse).astype(out_ref.dtype)


def firstnet_forward(x, params, *, tile_batch=None):
    """x: any shape whose trailing dims flatten to image_size (NCHW images OK).

    params = (w0_bf16, b0_f32, w1_bf16, b1_f32, w2_bf16, b2_f32), weights as (in, out).
    """
    w0, b0, w1, b1, w2, b2 = params
    image_size = w0.shape[0]
    n_classes = w2.shape[1]

    # Keep the input in its native dtype (cast happens per-tile inside the kernel).
    x2d = x.reshape(-1, image_size)
    batch = x2d.shape[0]

    # Batch tile: biggest of up to 512 rows (multiple of 8 sublanes). This keeps the
    # double-buffered x tile + resident weights far below even v5e's 16 MiB scoped VMEM
    # while amortizing the ~0.35 us/step grid overhead.
    if tile_batch is None:
        tile_batch = min(512, batch)
    tb = max(8, ((tile_batch + 7) // 8) * 8)

    # Pad batch up to a multiple of the tile so every block is full (padded rows are
    # zeros; their outputs are sliced off below).
    padded = ((batch + tb - 1) // tb) * tb
    if padded != batch:
        x2d = jnp.pad(x2d, ((0, padded - batch), (0, 0)))
    grid = (padded // tb,)

    # Advisory cost for XLA's scheduler.
    flops = 2 * padded * (image_size * 100 + 100 * 50 + 50 * 10)
    weight_bytes = sum(int(p.size) * p.dtype.itemsize for p in params)
    bytes_accessed = (padded * image_size * x2d.dtype.itemsize
                      + padded * n_classes * 4
                      + weight_bytes)
    cost = pl.CostEstimate(flops=flops,
                           transcendentals=padded * n_classes,
                           bytes_accessed=bytes_accessed)

    resident = lambda shape: pl.BlockSpec(shape, lambda i: (0, 0))

    out = pl.pallas_call(
        firstnet_kernel,
        out_shape=jax.ShapeDtypeStruct((padded, n_classes), jnp.float32),
        grid_spec=pltpu.PrefetchScalarGridSpec(
            num_scalar_prefetch=0,
            grid=grid,
            in_specs=[
                pl.BlockSpec((tb, image_size), lambda i: (i, 0)),  # x tile (pipelined)
                resident(w0.shape), resident(b0.shape),            # weights stay in VMEM
                resident(w1.shape), resident(b1.shape),
                resident(w2.shape), resident(b2.shape),
            ],
            out_specs=pl.BlockSpec((tb, n_classes), lambda i: (i, 0)),
        ),
        compiler_params=pltpu.CompilerParams(
            dimension_semantics=("parallel",),   # v7x: shard batch tiles across both TCs
        ),
        cost_estimate=cost,
    )(x2d, w0, b0, w1, b1, w2, b2)

    return out[:batch]


def init_params_f32(key, image_size):
    """Deterministic init mirroring nn.Linear (stored as (in, out)), in f32."""
    dims = [(image_size, 100), (100, 50), (50, 10)]
    params = []
    for i, (fan_in, fan_out) in enumerate(dims):
        kw, kb = jax.random.split(jax.random.fold_in(key, i))
        bound = 1.0 / jnp.sqrt(fan_in)
        w = jax.random.uniform(kw, (fan_in, fan_out), jnp.float32, -bound, bound)
        b = jax.random.uniform(kb, (1, fan_out), jnp.float32, -bound, bound)
        params += [w, b]
    return tuple(params)


def to_kernel_params(params_f32):
    """Weights -> bf16 (MXU-native), biases stay f32 (added to the f32 accumulator)."""
    w0, b0, w1, b1, w2, b2 = params_f32
    return (w0.astype(jnp.bfloat16), b0,
            w1.astype(jnp.bfloat16), b1,
            w2.astype(jnp.bfloat16), b2)


def firstnet_reference_mixed(x, kernel_params):
    """Pure-JAX reference replicating the kernel's bf16-matmul / f32-accumulate numerics."""
    w0, b0, w1, b1, w2, b2 = kernel_params
    image_size = w0.shape[0]
    h = x.reshape(-1, image_size)
    h = jnp.maximum(jnp.dot(h.astype(jnp.bfloat16), w0,
                            preferred_element_type=jnp.float32) + b0, 0.0)
    h = jnp.maximum(jnp.dot(h.astype(jnp.bfloat16), w1,
                            preferred_element_type=jnp.float32) + b1, 0.0)
    h = jnp.maximum(jnp.dot(h.astype(jnp.bfloat16), w2,
                            preferred_element_type=jnp.float32) + b2, 0.0)
    m = jnp.max(h, axis=-1, keepdims=True)
    s = h - m
    return s - jnp.log(jnp.sum(jnp.exp(s), axis=-1, keepdims=True))


def firstnet_reference_f32(x, params_f32):
    """Full-precision reference of the original module semantics."""
    w0, b0, w1, b1, w2, b2 = params_f32
    image_size = w0.shape[0]
    h = x.reshape(-1, image_size).astype(jnp.float32)
    h = jnp.maximum(h @ w0 + b0, 0.0)
    h = jnp.maximum(h @ w1 + b1, 0.0)
    h = jnp.maximum(h @ w2 + b2, 0.0)
    return jax.nn.log_softmax(h, axis=1)


if __name__ == "__main__":
    key = jax.random.PRNGKey(0)
    # Small synthetic "images": batch=8, 1 channel, 8x8 -> image_size = 64.
    B, C, H, W = 8, 1, 8, 8
    image_size = C * H * W

    k_x, k_p = jax.random.split(key)
    x = jax.random.normal(k_x, (B, C, H, W), jnp.float32)

    params_f32 = init_params_f32(k_p, image_size)
    kernel_params = to_kernel_params(params_f32)

    out = firstnet_forward(x, kernel_params)
    out = jax.block_until_ready(out)
    assert out.shape == (B, 10)

    # Tight check vs a reference with identical bf16/f32 mixed precision.
    ref_mixed = firstnet_reference_mixed(x, kernel_params)
    assert jnp.allclose(out, ref_mixed, atol=1e-4, rtol=1e-4), "mismatch vs mixed-precision reference"

    # Loose check vs the full-f32 module semantics (bf16 weights/activations only
    # introduce small error on this tiny MLP).
    ref_f32 = firstnet_reference_f32(x, params_f32)
    assert jnp.allclose(out, ref_f32, atol=5e-2, rtol=5e-2), "mismatch vs f32 reference"

    print("KERNEL_OK")
</pallas_src>

<mosaic_0001>
module attributes {stable_mosaic.version = 11 : i64} {
  func.func @firstnet_kernel(%arg0: i32, %arg1: memref<8x64xf32, #tpu.memory_space<vmem>>, %arg2: memref<64x100xbf16, #tpu.memory_space<vmem>>, %arg3: memref<1x100xf32, #tpu.memory_space<vmem>>, %arg4: memref<100x50xbf16, #tpu.memory_space<vmem>>, %arg5: memref<1x50xf32, #tpu.memory_space<vmem>>, %arg6: memref<50x10xbf16, #tpu.memory_space<vmem>>, %arg7: memref<1x10xf32, #tpu.memory_space<vmem>>, %arg8: memref<8x10xf32, #tpu.memory_space<vmem>>) attributes {dimension_semantics = [#tpu.dimension_semantics<parallel>], iteration_bounds = array<i64: 1>, scalar_prefetch = 0 : i64, scratch_operands = 0 : i64, tpu.core_type = #tpu.core_type<tc>, window_params = [{transform_indices = @transform_0, window_bounds = array<i64: 8, 64>}, {pipeline_mode = #tpu.pipeline_mode<synchronous>, transform_indices = @transform_1, window_bounds = array<i64: 64, 100>}, {pipeline_mode = #tpu.pipeline_mode<synchronous>, transform_indices = @transform_2, window_bounds = array<i64: 1, 100>}, {pipeline_mode = #tpu.pipeline_mode<synchronous>, transform_indices = @transform_3, window_bounds = array<i64: 100, 50>}, {pipeline_mode = #tpu.pipeline_mode<synchronous>, transform_indices = @transform_4, window_bounds = array<i64: 1, 50>}, {pipeline_mode = #tpu.pipeline_mode<synchronous>, transform_indices = @transform_5, window_bounds = array<i64: 50, 10>}, {pipeline_mode = #tpu.pipeline_mode<synchronous>, transform_indices = @transform_6, window_bounds = array<i64: 1, 10>}, {transform_indices = @transform_7, window_bounds = array<i64: 8, 10>}]} {
    %c0 = arith.constant 0 : index
    %c0_0 = arith.constant 0 : index
    %0 = vector.load %arg1[%c0, %c0_0] : memref<8x64xf32, #tpu.memory_space<vmem>>, vector<8x64xf32>
    %1 = arith.truncf %0 : vector<8x64xf32> to vector<8x64xbf16>
    %c0_1 = arith.constant 0 : index
    %c0_2 = arith.constant 0 : index
    %2 = vector.load %arg2[%c0_1, %c0_2] : memref<64x100xbf16, #tpu.memory_space<vmem>>, vector<64x100xbf16>
    %cst = arith.constant dense<0.000000e+00> : vector<8x100xf32>
    %3 = tpu.matmul %1, %2, %cst {dimension_numbers = #tpu.dot_dimension_numbers<[1], [0], [0], [1], [0, 0, 1, 1], [], []>} : vector<8x64xbf16>, vector<64x100xbf16>, vector<8x100xf32> -> vector<8x100xf32>
    %c0_3 = arith.constant 0 : index
    %c0_4 = arith.constant 0 : index
    %4 = vector.load %arg3[%c0_3, %c0_4] : memref<1x100xf32, #tpu.memory_space<vmem>>, vector<1x100xf32>
    %5 = vector.broadcast %4 : vector<1x100xf32> to vector<8x100xf32>
    %6 = arith.addf %3, %5 : vector<8x100xf32>
    %cst_5 = arith.constant 0.000000e+00 : f32
    %7 = vector.broadcast %cst_5 : f32 to vector<8x100xf32>
    %8 = arith.maximumf %6, %7 : vector<8x100xf32>
    %9 = arith.truncf %8 : vector<8x100xf32> to vector<8x100xbf16>
    %c0_6 = arith.constant 0 : index
    %c0_7 = arith.constant 0 : index
    %10 = vector.load %arg4[%c0_6, %c0_7] : memref<100x50xbf16, #tpu.memory_space<vmem>>, vector<100x50xbf16>
    %cst_8 = arith.constant dense<0.000000e+00> : vector<8x50xf32>
    %11 = tpu.matmul %9, %10, %cst_8 {dimension_numbers = #tpu.dot_dimension_numbers<[1], [0], [0], [1], [0, 0, 1, 1], [], []>} : vector<8x100xbf16>, vector<100x50xbf16>, vector<8x50xf32> -> vector<8x50xf32>
    %c0_9 = arith.constant 0 : index
    %c0_10 = arith.constant 0 : index
    %12 = vector.load %arg5[%c0_9, %c0_10] : memref<1x50xf32, #tpu.memory_space<vmem>>, vector<1x50xf32>
    %13 = vector.broadcast %12 : vector<1x50xf32> to vector<8x50xf32>
    %14 = arith.addf %11, %13 : vector<8x50xf32>
    %cst_11 = arith.constant 0.000000e+00 : f32
    %15 = vector.broadcast %cst_11 : f32 to vector<8x50xf32>
    %16 = arith.maximumf %14, %15 : vector<8x50xf32>
    %17 = arith.truncf %16 : vector<8x50xf32> to vector<8x50xbf16>
    %c0_12 = arith.constant 0 : index
    %c0_13 = arith.constant 0 : index
    %18 = vector.load %arg6[%c0_12, %c0_13] : memref<50x10xbf16, #tpu.memory_space<vmem>>, vector<50x10xbf16>
    %cst_14 = arith.constant dense<0.000000e+00> : vector<8x10xf32>
    %19 = tpu.matmul %17, %18, %cst_14 {dimension_numbers = #tpu.dot_dimension_numbers<[1], [0], [0], [1], [0, 0, 1, 1], [], []>} : vector<8x50xbf16>, vector<50x10xbf16>, vector<8x10xf32> -> vector<8x10xf32>
    %c0_15 = arith.constant 0 : index
    %c0_16 = arith.constant 0 : index
    %20 = vector.load %arg7[%c0_15, %c0_16] : memref<1x10xf32, #tpu.memory_space<vmem>>, vector<1x10xf32>
    %21 = vector.broadcast %20 : vector<1x10xf32> to vector<8x10xf32>
    %22 = arith.addf %19, %21 : vector<8x10xf32>
    %cst_17 = arith.constant 0.000000e+00 : f32
    %23 = vector.broadcast %cst_17 : f32 to vector<8x10xf32>
    %24 = arith.maximumf %22, %23 : vector<8x10xf32>
    %cst_18 = arith.constant dense<0xFF800000> : vector<8xf32>
    %25 = vector.multi_reduction <maximumf>, %24, %cst_18 [1] : vector<8x10xf32> to vector<8xf32>
    %26 = vector.shape_cast %25 : vector<8xf32> to vector<8x1xf32>
    %27 = vector.broadcast %26 : vector<8x1xf32> to vector<8x10xf32>
    %28 = arith.subf %24, %27 : vector<8x10xf32>
    %29 = math.exp %28 : vector<8x10xf32>
    %cst_19 = arith.constant dense<0.000000e+00> : vector<8xf32>
    %30 = vector.multi_reduction <add>, %29, %cst_19 [1] : vector<8x10xf32> to vector<8xf32>
    %31 = vector.shape_cast %30 : vector<8xf32> to vector<8x1xf32>
    %32 = math.log %31 : vector<8x1xf32>
    %33 = vector.broadcast %32 : vector<8x1xf32> to vector<8x10xf32>
    %34 = arith.subf %28, %33 : vector<8x10xf32>
    %c0_20 = arith.constant 0 : index
    %c0_21 = arith.constant 0 : index
    %35 = vector.load %arg8[%c0_20, %c0_21] : memref<8x10xf32, #tpu.memory_space<vmem>>, vector<8x10xf32>
    tpu.vector_store %arg8[%c0_20, %c0_21], %34 {strides = array<i32>} : memref<8x10xf32, #tpu.memory_space<vmem>>, vector<8x10xf32>,
    return
  }
  func.func @transform_0(%arg0: i32) -> (i32, i32) {
    %c0_i32 = arith.constant 0 : i32
    %c0_i32_0 = arith.constant 0 : i32
    return %arg0, %c0_i32 : i32, i32
  }
  func.func @transform_1(%arg0: i32) -> (i32, i32) {
    %c0_i32 = arith.constant 0 : i32
    %c0_i32_0 = arith.constant 0 : i32
    %c0_i32_1 = arith.constant 0 : i32
    return %c0_i32, %c0_i32_0 : i32, i32
  }
  func.func @transform_2(%arg0: i32) -> (i32, i32) {
    %c0_i32 = arith.constant 0 : i32
    %c0_i32_0 = arith.constant 0 : i32
    %c0_i32_1 = arith.constant 0 : i32
    return %c0_i32, %c0_i32_0 : i32, i32
  }
  func.func @transform_3(%arg0: i32) -> (i32, i32) {
    %c0_i32 = arith.constant 0 : i32
    %c0_i32_0 = arith.constant 0 : i32
    %c0_i32_1 = arith.constant 0 : i32
    return %c0_i32, %c0_i32_0 : i32, i32
  }
  func.func @transform_4(%arg0: i32) -> (i32, i32) {
    %c0_i32 = arith.constant 0 : i32
    %c0_i32_0 = arith.constant 0 : i32
    %c0_i32_1 = arith.constant 0 : i32
    return %c0_i32, %c0_i32_0 : i32, i32
  }
  func.func @transform_5(%arg0: i32) -> (i32, i32) {
    %c0_i32 = arith.constant 0 : i32
    %c0_i32_0 = arith.constant 0 : i32
    %c0_i32_1 = arith.constant 0 : i32
    return %c0_i32, %c0_i32_0 : i32, i32
  }
  func.func @transform_6(%arg0: i32) -> (i32, i32) {
    %c0_i32 = arith.constant 0 : i32
    %c0_i32_0 = arith.constant 0 : i32
    %c0_i32_1 = arith.constant 0 : i32
    return %c0_i32, %c0_i32_0 : i32, i32
  }
  func.func @transform_7(%arg0: i32) -> (i32, i32) {
    %c0_i32 = arith.constant 0 : i32
    %c0_i32_0 = arith.constant 0 : i32
    return %arg0, %c0_i32 : i32, i32
  }
}

</mosaic_0001>

<bundles_post_ra>
// kernel: tpu_custom_call.1
= control target key start
LH: loop header
LB: loop body
LE: loop exit
PB: predicated region body
PF: predicated region fallthrough
CT: control target
= control target key end

     0   :  { %v463_v1 = vmov 0.0   ;;  %vm464_vm0 = vmmov 0   ;;  %s581_s0 = inlined_call_operand.vmem [shape: f32[8,64], index: 0, kind: input, shape index: {}]   ;;  %s582_s1 = inlined_call_operand.vmem [shape: bf16[64,100], index: 1, kind: input, shape index: {}]   ;;  %s583_s2 = inlined_call_operand.vmem [shape: f32[1,100], index: 2, kind: input, shape index: {}]   ;;  %s584_s3 = inlined_call_operand.vmem [shape: bf16[100,50], index: 3, kind: input, shape index: {}]   ;;  %s585_s4 = inlined_call_operand.vmem [shape: f32[1,50], index: 4, kind: input, shape index: {}]   ;;  %s586_s5 = inlined_call_operand.vmem [shape: bf16[50,10], index: 5, kind: input, shape index: {}]   ;;  %s587_s6 = inlined_call_operand.vmem [shape: f32[1,10], index: 6, kind: input, shape index: {}]   ;;  %s588_s7 = inlined_call_operand.hbm [shape: f32[8,10], index: 7, kind: output, shape index: {}]  }
   0x1   :  { %v420_v0 = vld [vmem:[%s582_s1] sm:$0xff]   ;;  %375 = vmatprep.subr.bf16.mxu0 %v463_v1  ;;  %387 = vmatprep.subr.bf16.mxu1 %v463_v1  ;;  %v421_v2 = vld [vmem:[%s582_s1 + $0x8] sm:$0xff]   ;;  %v422_v4 = vld [vmem:[%s582_s1 + $0x10] sm:$0xff]  }
   0x2   :  { %376 = vmatpush3.bf16.msra.mxu0 %v420_v0  ;;  %383 = vmatprep.mubr.msk.bf16.mxu0 %vm464_vm0, %v463_v1  ;;  %v424_v3 = vld [vmem:[%s584_s3] sm:$0xff]   ;;  %v425_v5 = vld [vmem:[%s584_s3 + $0x8] sm:$0xff]   ;;  %v423_v6 = vld [vmem:[%s582_s1 + $0x18] sm:$0xff]  }
   0x3   :  { %377 = vmatprep.subr.bf16.mxu0 %v463_v1  ;;  %401 = vmatprep.mubr.msk.bf16.mxu1 %vm464_vm0, %v463_v1  ;;  %v28_v7 = vld [vmem:[%s581_s0] sm:$0xff]  ;;  %v426_v8 = vld [vmem:[%s584_s3 + $0x10] sm:$0xff]  }
   0x4   :  { %388 = vmatpush3.bf16.msra.mxu1 %v424_v3  ;;  %v29_v9 = vpack.c.bf16 %v28_v7, %v28_v7 }
   0x5   :  { %389 = vmatprep.subr.bf16.mxu1 %v463_v1 }
   0x6   :  { %378 = vmatpush3.bf16.msra.mxu0 %v421_v2 }
   0x7   :  { %379 = vmatprep.subr.bf16.mxu0 %v463_v1 }
   0x8   :  { %390 = vmatpush3.bf16.msra.mxu1 %v425_v5 }
   0x9   :  { %391 = vmatprep.subr.bf16.mxu1 %v463_v1 }
   0xa   :  { %380 = vmatpush3.bf16.msra.mxu0 %v422_v4 }
   0xb   :  { %381 = vmatprep.subr.bf16.mxu0 %v463_v1 }
   0xc   :  { %12 = vsyncpa [#allocation3], 0  ;;  %vm69_vm1 = vcmask 523264   ;;  %392 = vmatpush3.bf16.msra.mxu1 %v426_v8  ;;  %v427_v10 = vld [vmem:[%s584_s3 + $0x18] sm:$0xff]   ;;  %v428_v11 = vld [vmem:[%s584_s3 + $0x20] sm:$0xff]   ;;  %vm178_vm2 = vcmask 1041408  }
   0xd   :  { %393 = vmatprep.subr.bf16.mxu1 %v463_v1  ;;  %v429_v12 = vld [vmem:[%s584_s3 + $0x28] sm:$0xff]   ;;  %v430_v13 = vld [vmem:[%s584_s3 + $0x30] ss:$0 sps:$4 sm:$0x33]   ;;  %v431_v15 = vld [vmem:[%s586_s5] sm:$0xff]   ;;  %vm174_vm3 = vcmask 818176  }
   0xe   :  { %382 = vmatpush3.bf16.msra.mxu0 %v423_v6  ;;  %v180_v14 = vsel %vm178_vm2, %v430_v13, 0  ;;  %v432_v16 = vld [vmem:[%s586_s5 + $0x8] sm:$0xff]   ;;  %v336_v17 = vld [vmem:[%s583_s2] ss:$0 sm:$0xff]  ;;  %v433_v25 = vld [vmem:[%s586_s5 + $0x10] sm:$0xff]   ;;  %vm263_vm4 = vcmask 1040384  }
   0xf   :  { %405 = vmatprep.subr.bf16.mxu0 %v463_v1  ;;  %v434_v26 = vld [vmem:[%s586_s5 + $0x18] ss:$0 sps:$4 sm:$0x11]   ;;  %v342_v28 = vld [vmem:[%s585_s4] ss:$0 sm:$0xff]  ;;  %vm259_vm5 = vcmask 408576  }
  0x10   :  { %394 = vmatpush3.bf16.msra.mxu1 %v427_v10  ;;  %v265_v27 = vsel %vm263_vm4, %v434_v26, 0  ;;  %v351_v36 = vld [vmem:[%s587_s6] ss:$0 sm:$0xff]  ;;  %vm308_vm6 = vcmask 80896   ;;  %s465_s4 = smov [#allocation2]  }
  0x11   :  { %384 = vmatmul.mubr.msk.bf16.vlgmr.msra.gmra.mrb[0].mxu0 %vm69_vm1, %v29_v9  ;;  %395 = vmatprep.subr.bf16.mxu1 %v463_v1  ;;  %s328_s5 = sshll.u32 %s465_s4, 4  ;;  %s329_s5 = int_to_ptr.vmem [resolvable:$true] %s328_s5 }
  0x12   :  { %413 = vmatprep.mubr.msk.bf16.mxu0 %vm464_vm0, %v463_v1  ;;  %406 = vmatpush3.bf16.msra.mxu0 %v431_v15  ;;  %s439_s6 = scalar_lea.vmem %s329_s5, 128  ;;  %p444_p1 = scmp.lt.s32.totalorder %s329_s5, %s329_s5 }
  0x13   :  { %407 = vmatprep.subr.bf16.mxu0 %v463_v1  ;;  %p440_p0 = scmp.ne.s32.totalorder %s329_s5, %s439_s6  ;;  %p445_p2 = scmp.lt.s32.totalorder %s439_s6, %s439_s6 }
  0x14   :  { %396 = vmatpush3.bf16.msra.mxu1 %v428_v11 }
  0x15   :  { %397 = vmatprep.subr.bf16.mxu1 %v463_v1  ;;  %p446_p3 = por %p445_p2, %p444_p1 }
  0x16   :  { %408 = vmatpush3.bf16.msra.mxu0 %v432_v16 }
  0x17   :  { %409 = vmatprep.subr.bf16.mxu0 %v463_v1  ;;  %p447_p4 = pnand %p446_p3, %p440_p0 }
  0x18   :  { %398 = vmatpush3.bf16.msra.mxu1 %v429_v12 }
  0x19   :  { %399 = vmatprep.subr.bf16.mxu1 %v463_v1 }
  0x1a   :  { %410 = vmatpush3.bf16.msra.mxu0 %v433_v25 }
  0x1b   :  { %411 = vmatprep.subr.bf16.mxu0 %v463_v1 }
  0x1c   :  { %400 = vmatpush3.bf16.msra.mxu1 %v180_v14 }
  0x1e   :  { %412 = vmatpush3.bf16.msra.mxu0 %v265_v27 }
  0xe4   :  { %v107_v18 = vpop.f32.mrb[0].mxu0 }
  0xe5   :  { %v108_v19 = vadd.f32 %v336_v17, %v107_v18  ;;  %v385_v20 = vpop.f32.mrb[1].mxu0 }
  0xe6   :  { %v110_v21 = vpop.f32.mrb[2].mxu0 }
  0xe7   :  { %v113_v22 = vmax.f32 %v108_v19, 0.0  ;;  %v386_v23 = vpop.f32.mrb[3].mxu0 }
  0xe9   :  { %v114_v24 = vpack.c.bf16 %v113_v22, %v113_v22 }
  0xeb   :  { %402 = vmatmul.mubr.msk.bf16.vlgmr.msra.gmra.mrb[0].mxu1 %vm174_vm3, %v114_v24 }
 0x1be   :  { %v216_v29 = vpop.f32.mrb[0].mxu1 }
 0x1bf   :  { %v217_v30 = vadd.f32 %v342_v28, %v216_v29  ;;  %v403_v31 = vpop.f32.mrb[1].mxu1 }
 0x1c0   :  { %v219_v32 = vpop.f32.mrb[2].mxu1 }
 0x1c1   :  { %v222_v33 = vmax.f32 %v217_v30, 0.0  ;;  %v404_v34 = vpop.f32.mrb[3].mxu1 }
 0x1c3   :  { %v223_v35 = vpack.c.bf16 %v222_v33, %v222_v33 }
 0x1c5   :  { %414 = vmatmul.mubr.msk.bf16.vlgmr.msra.gmra.mrb[4].mxu0 %vm259_vm5, %v223_v35 }
 0x298   :  { %v301_v37 = vpop.f32.mrb[4].mxu0 }
 0x299   :  { %v302_v38 = vadd.f32 %v351_v36, %v301_v37  ;;  %v415_v39 = vpop.f32.mrb[5].mxu0 }
 0x29a   :  { %v304_v40 = vpop.f32.mrb[6].mxu0 }
 0x29b   :  { %v307_v41 = vmax.f32 %v302_v38, 0.0  ;;  %v416_v42 = vpop.f32.mrb[7].mxu0 }
 0x29d   :  { %v309_v43 = vsel %vm308_vm6, %v307_v41, -inf }
 0x29e   :  { %310 = vmax.xlane.f32.xlu0 %v309_v43 }
 0x32b   :  { %v311_v44 = vpop.xlane.xlu0 %310 }
 0x32c   :  { %v312_v45 = vsub.f32 %v307_v41, %v311_v44 }
 0x32e   :  { %v313_v46 = vmul.f32 1.442695, %v312_v45 }
 0x330   :  { %435 = vpow2.f32 %v313_v46 }
 0x33a   :  { %v436_v47 = vpop.eup %435 }
 0x33b   :  { %v315_v48 = vsel %vm308_vm6, %v436_v47, 0.0 }
 0x33c   :  { %316 = vadd.xlane.f32.xlu0 %v315_v48 }
 0x3c9   :  { %v317_v49 = vpop.xlane.xlu0 %316 }
 0x3ca   :  { %437 = vlog2.f32 %v317_v49 }
 0x3d4   :  { %v438_v50 = vpop.eup %437 }
 0x3d5   :  { %v319_v51 = vmul.f32 0.6931472, %v438_v50 }
 0x3d7   :  { %v320_v52 = vsub.f32 %v312_v45, %v319_v51 }
 0x3d9   :  { %321 = vst.msk [vmem:[#allocation2] sm:$0xff] %vm308_vm6, %v320_v52 }
 0x3da   :  { %450 = shalt.err (!%p447_p4)
}
 0x3db   :  { %s451_s14 = scalar_lea.hbm %s588_s7, 128 }
 0x3dc   :  { %p452_p5 = scmp.ne.s32.totalorder %s588_s7, %s451_s14  ;;  %p455_p6 = scmp.lt.u32.totalorder %s451_s14, %s588_s7 }
 0x3de   :  { %p457_p7 = pnand %p455_p6, %p452_p5 }
 0x3e0   :  { %460 = shalt.err (!%p457_p7)
}
 0x3e1   :  { %331 = dma.vmem_to_hbm [thread:$0]  %s329_s5, 128, %s588_s7, [#allocation3]  }
 0x3e2   :  { %461 = dma.done.wait [#allocation3], 128  }
 0x3e3   :  { %462 = vsyncadd [#allocation3], 4294967168 }
 0x3e4   :  { %335 = vsyncpa [#allocation3], 1 }

</bundles_post_ra>
